<compile_context>
chip_gen: v7x
topology: tpu7x:2x2x1
jax: 0.10.0
libtpu: 0.0.40
codegen_flags: <defaults>
</compile_context>

<pallas_src>
import functools

import jax
import jax.numpy as jnp
from jax.experimental import pallas as pl
from jax.experimental.pallas import tpu as pltpu


def _round_up(x, m):
    return (x + m - 1) // m * m


def _tpu_defaults():
    """Per-generation (row_tile_elems, fused_elems_limit, vmem_limit_bytes)."""
    kind = ""
    try:
        kind = (jax.devices()[0].device_kind or "").lower()
    except Exception:
        pass
    if "v7" in kind or "7x" in kind:
        # v7x: only 64 MiB physical VMEM -> modest resident threshold, but
        # ~3.2 TB/s HBM -> larger tiles to amortize ~0.35us per-grid-step cost.
        return 2048 * 512, 1 * 1024 * 1024, 40 * 1024 * 1024
    if "v5" in kind:
        # v5e: 16 MiB scoped-VMEM default, ~820 GB/s HBM -> 2 MiB tiles, do not
        # raise the scoped limit aggressively.
        return 1024 * 512, 1 * 1024 * 1024, 32 * 1024 * 1024
    if "v6" in kind:
        # v6e: 128 MiB VMEM -> can keep a larger weight resident.
        return 1024 * 512, 2 * 1024 * 1024, 64 * 1024 * 1024
    # Unknown generation: conservative (v7x-like) limits.
    return 1024 * 512, 1 * 1024 * 1024, 32 * 1024 * 1024


# --------------------------------------------------------------------------- #
# Kernels
# --------------------------------------------------------------------------- #
def _fused_kernel(alpha_ref, w_ref, o_ref, *, n_elems, levels):
    """Single-call path: weight resident in VMEM; stats + epilogue + quant."""
    w = w_ref[...].astype(jnp.float32)
    n_f = float(n_elems)
    # Two-step reductions (sublane then lane) -> (1, 1) vectors.
    psum = jnp.sum(w, axis=0, keepdims=True)
    psq = jnp.sum(w * w, axis=0, keepdims=True)
    total = jnp.sum(psum, axis=1, keepdims=True)
    total_sq = jnp.sum(psq, axis=1, keepdims=True)
    mean = total * (1.0 / n_f)
    # Unbiased variance, single pass, f32 (zero padding contributes 0 to both sums).
    var = (total_sq - n_f * mean * mean) * (1.0 / (n_f - 1.0))
    inv_std = jax.lax.rsqrt(var)
    alpha = alpha_ref[...]                     # (1, 1)
    scale = inv_std / alpha                    # 1 / (std * alpha)
    out_scale = alpha * (1.0 / float(levels))  # alpha / levels
    c = jnp.clip((w - mean) * scale, -1.0, 1.0)
    # round-half-to-even is odd-symmetric, so round(|c|*L)*sign(c) == round(c*L).
    o_ref[...] = (jnp.round(c * float(levels)) * out_scale).astype(o_ref.dtype)


def _stats_params_kernel(alpha_ref, w_ref, mean_ref, scale_ref, qscale_ref,
                         sum_sc, sq_sc, *, n_elems, levels, rows, row_tile):
    """Pass 1: per-lane partial sums + fused scalar epilogue on the last step."""
    i = pl.program_id(0)

    @pl.when(i == 0)
    def _init():
        sum_sc[...] = jnp.zeros_like(sum_sc)
        sq_sc[...] = jnp.zeros_like(sq_sc)

    w = w_ref[...].astype(jnp.float32)
    if rows % row_tile != 0:
        # Trailing partial block: out-of-bounds rows hold unspecified data, so
        # they MUST be masked out before summing.
        gid = jax.lax.broadcasted_iota(jnp.int32, w.shape, 0) + i * row_tile
        w = jnp.where(gid < rows, w, 0.0)
    sum_sc[...] += jnp.sum(w, axis=0, keepdims=True)
    sq_sc[...] += jnp.sum(w * w, axis=0, keepdims=True)

    @pl.when(i == pl.num_programs(0) - 1)
    def _finalize():
        n_f = float(n_elems)
        total = jnp.sum(sum_sc[...], axis=1, keepdims=True)     # (1, 1)
        total_sq = jnp.sum(sq_sc[...], axis=1, keepdims=True)   # (1, 1)
        mean = total * (1.0 / n_f)
        var = (total_sq - n_f * mean * mean) * (1.0 / (n_f - 1.0))
        inv_std = jax.lax.rsqrt(var)
        alpha = alpha_ref[...]
        mean_ref[...] = mean
        scale_ref[...] = inv_std / alpha                        # 1 / (std * alpha)
        qscale_ref[...] = alpha * (1.0 / float(levels))         # alpha / levels


def _quant_kernel(mean_ref, scale_ref, qscale_ref, w_ref, o_ref, *, levels):
    """Pass 2: out = round(clip((w - mean)*scale, -1, 1) * L) * (alpha/L)."""
    w = w_ref[...].astype(jnp.float32)
    c = jnp.clip((w - mean_ref[...]) * scale_ref[...], -1.0, 1.0)
    o_ref[...] = (jnp.round(c * float(levels)) * qscale_ref[...]).astype(o_ref.dtype)


# --------------------------------------------------------------------------- #
# Reference / fallback
# --------------------------------------------------------------------------- #
def _quantize_jax(weight, wgt_alpha, b):
    """Pure-JAX path (bitwise follows the torch forward); also used as reference."""
    w = weight.astype(jnp.float32)
    mean = jnp.mean(w)
    std = jnp.std(w, ddof=1)
    x = jnp.clip((w - mean) / std / wgt_alpha, -1.0, 1.0)
    levels = float(2 ** b - 1)
    q = jnp.round(jnp.abs(x) * levels) / levels * jnp.sign(x)
    return (q * wgt_alpha).astype(weight.dtype)


# --------------------------------------------------------------------------- #
# Wrapper
# --------------------------------------------------------------------------- #
def weight_quantize_fn(weight, wgt_alpha, w_bit, *,
                       row_tile_elems=None,
                       fused_elems_limit=None,
                       min_pallas_elems=65536,
                       force_pallas=False):
    """JAX/Pallas equivalent of the PyTorch `weight_quantize_fn.forward`."""
    b = w_bit - 1                               # module stores self.w_bit = w_bit - 1
    levels = float(2 ** b - 1)
    alpha = jnp.asarray(wgt_alpha, jnp.float32)
    n = weight.size
    orig_shape = weight.shape

    if n < min_pallas_elems and not force_pallas:
        # Tiny weights: pallas_call launch + per-step overhead dominates.
        return _quantize_jax(weight, alpha, b)

    def_row_tile, def_fused, vmem_limit = _tpu_defaults()
    if row_tile_elems is None:
        row_tile_elems = def_row_tile
    if fused_elems_limit is None:
        fused_elems_limit = def_fused

    # ---- layout: lane-dense (rows, lane) slab, no pad copy in the common case ----
    lane = None
    for cand in (512, 256, 128):
        if n % cand == 0:
            lane = cand
            break
    if lane is None:
        # Rare ragged case (n not a multiple of 128): pad < one lane width of
        # zeros (contribute 0 to both sums; divide by true n) and strip after.
        lane = 128
        n_slab = _round_up(n, lane)
        flat = jnp.pad(weight.reshape(-1), (0, n_slab - n))
        w2d = flat.reshape(n_slab // lane, lane)
        padded = True
    else:
        w2d = weight.reshape(n // lane, lane)
        padded = False
    rows = w2d.shape[0]
    alpha2d = alpha.reshape(1, 1)

    if n <= fused_elems_limit:
        # ---- fused single-call path: weight resident in VMEM (2n HBM traffic) ----
        out2d = pl.pallas_call(
            functools.partial(_fused_kernel, n_elems=n, levels=levels),
            grid=(1,),
            in_specs=[
                pl.BlockSpec((1, 1), lambda i: (0, 0)),          # alpha
                pl.BlockSpec((rows, lane), lambda i: (0, 0)),    # full-array block
            ],
            out_specs=pl.BlockSpec((rows, lane), lambda i: (0, 0)),
            out_shape=jax.ShapeDtypeStruct((rows, lane), weight.dtype),
            compiler_params=pltpu.CompilerParams(
                dimension_semantics=("arbitrary",),
                vmem_limit_bytes=vmem_limit),
        )(alpha2d, w2d)
    else:
        # ---- two-pass path (3n HBM traffic) ----
        row_tile = max(8, _round_up(min(row_tile_elems // lane, rows), 8))
        num_tiles = pl.cdiv(rows, row_tile)

        # Pass 1: fused single-read statistics + in-kernel scalar epilogue.
        mean_p, scale_p, qscale_p = pl.pallas_call(
            functools.partial(_stats_params_kernel, n_elems=n, levels=levels,
                              rows=rows, row_tile=row_tile),
            grid=(num_tiles,),
            in_specs=[
                pl.BlockSpec((1, 1), lambda i: (0, 0)),            # alpha
                pl.BlockSpec((row_tile, lane), lambda i: (i, 0)),  # weight tile
            ],
            out_specs=(
                pl.BlockSpec((1, 1), lambda i: (0, 0)),
                pl.BlockSpec((1, 1), lambda i: (0, 0)),
                pl.BlockSpec((1, 1), lambda i: (0, 0)),
            ),
            out_shape=(
                jax.ShapeDtypeStruct((1, 1), jnp.float32),
                jax.ShapeDtypeStruct((1, 1), jnp.float32),
                jax.ShapeDtypeStruct((1, 1), jnp.float32),
            ),
            scratch_shapes=[
                pltpu.VMEM((1, lane), jnp.float32),
                pltpu.VMEM((1, lane), jnp.float32),
            ],
            compiler_params=pltpu.CompilerParams(
                dimension_semantics=("arbitrary",),
                vmem_limit_bytes=vmem_limit),
        )(alpha2d, w2d)

        # Pass 2: elementwise quantization (parallel over tiles; megacore-friendly).
        out2d = pl.pallas_call(
            functools.partial(_quant_kernel, levels=levels),
            grid=(num_tiles,),
            in_specs=[
                pl.BlockSpec((1, 1), lambda i: (0, 0)),
                pl.BlockSpec((1, 1), lambda i: (0, 0)),
                pl.BlockSpec((1, 1), lambda i: (0, 0)),
                pl.BlockSpec((row_tile, lane), lambda i: (i, 0)),
            ],
            out_specs=pl.BlockSpec((row_tile, lane), lambda i: (i, 0)),
            out_shape=jax.ShapeDtypeStruct((rows, lane), weight.dtype),
            compiler_params=pltpu.CompilerParams(
                dimension_semantics=("parallel",),
                vmem_limit_bytes=vmem_limit),
        )(mean_p, scale_p, qscale_p, w2d)

    if padded:
        return out2d.reshape(-1)[:n].reshape(orig_shape)
    return out2d.reshape(orig_shape)


# --------------------------------------------------------------------------- #
# Self-test
# --------------------------------------------------------------------------- #
def _check(name, out, ref, step, min_exact_frac):
    # Quantization is a step function: an element sitting exactly on a rounding
    # boundary may flip by one level under f32 reduction-order differences
    # between the kernel's stats and the reference's. Require essentially every
    # element to match exactly and any disagreement to be at most one step.
    diff = jnp.abs(out.astype(jnp.float32) - ref.astype(jnp.float32))
    max_diff = float(jnp.max(diff))
    frac_exact = float(jnp.mean((diff < 1e-5).astype(jnp.float32)))
    assert max_diff <= step + 1e-4, f"{name}: max diff {max_diff} exceeds one step"
    assert frac_exact >= min_exact_frac, f"{name}: only {frac_exact:.5f} exact"


if __name__ == "__main__":
    key = jax.random.PRNGKey(0)
    k1, k2 = jax.random.split(key)
    w_bit = 4
    wgt_alpha = jnp.float32(3.0)                 # Parameter(torch.tensor(3.0))
    step = float(wgt_alpha) / (2 ** (w_bit - 1) - 1)

    # Small conv-style weight (OIHW): 32x16x3x3 -> 4608 elements (multiple of 512).
    weight = jax.random.normal(k1, (32, 16, 3, 3), dtype=jnp.float32) * 0.5
    ref = _quantize_jax(weight, wgt_alpha, w_bit - 1)

    # 1) Fused single-pallas_call path (weight resident in VMEM).
    out_fused = jax.block_until_ready(
        weight_quantize_fn(weight, wgt_alpha, w_bit, force_pallas=True))
    assert out_fused.shape == weight.shape and out_fused.dtype == weight.dtype
    _check("fused", out_fused, ref, step, 0.995)

    # 2) Two-pass path with multiple tiles and a masked trailing partial block
    #    (rows=9, row_tile=8 -> second block has one valid row).
    out_2p = jax.block_until_ready(
        weight_quantize_fn(weight, wgt_alpha, w_bit, force_pallas=True,
                           fused_elems_limit=0, row_tile_elems=8 * 512))
    assert out_2p.shape == weight.shape and out_2p.dtype == weight.dtype
    _check("two-pass", out_2p, ref, step, 0.995)

    # 3) Ragged fallback (270 elements, not a multiple of 128 -> tiny pad+strip).
    weight_r = jax.random.normal(k2, (10, 3, 3, 3), dtype=jnp.float32) * 0.5
    ref_r = _quantize_jax(weight_r, wgt_alpha, w_bit - 1)
    out_r = jax.block_until_ready(
        weight_quantize_fn(weight_r, wgt_alpha, w_bit, force_pallas=True))
    assert out_r.shape == weight_r.shape and out_r.dtype == weight_r.dtype
    _check("ragged", out_r, ref_r, step, 0.98)

    # 4) Tiny-weight pure-JAX fast path (default thresholds).
    out_fast = jax.block_until_ready(weight_quantize_fn(weight, wgt_alpha, w_bit))
    assert float(jnp.max(jnp.abs(out_fast - ref))) < 1e-5

    print("KERNEL_OK")
</pallas_src>

<mosaic_0001>
module attributes {stable_mosaic.version = 11 : i64} {
  func.func @_fused_kernel(%arg0: i32, %arg1: memref<1x1xf32, #tpu.memory_space<vmem>>, %arg2: memref<9x512xf32, #tpu.memory_space<vmem>>, %arg3: memref<9x512xf32, #tpu.memory_space<vmem>>) attributes {dimension_semantics = [#tpu.dimension_semantics<arbitrary>], iteration_bounds = array<i64: 1>, scalar_prefetch = 0 : i64, scratch_operands = 0 : i64, tpu.core_type = #tpu.core_type<tc>, window_params = [{pipeline_mode = #tpu.pipeline_mode<synchronous>, transform_indices = @transform_0, window_bounds = array<i64: 1, 1>}, {pipeline_mode = #tpu.pipeline_mode<synchronous>, transform_indices = @transform_1, window_bounds = array<i64: 9, 512>}, {pipeline_mode = #tpu.pipeline_mode<synchronous>, transform_indices = @transform_2, window_bounds = array<i64: 9, 512>}]} {
    %c0 = arith.constant 0 : index
    %c0_0 = arith.constant 0 : index
    %0 = vector.load %arg2[%c0, %c0_0] : memref<9x512xf32, #tpu.memory_space<vmem>>, vector<9x512xf32>
    %cst = arith.constant dense<0.000000e+00> : vector<512xf32>
    %1 = vector.multi_reduction <add>, %0, %cst [0] : vector<9x512xf32> to vector<512xf32>
    %2 = vector.shape_cast %1 : vector<512xf32> to vector<1x512xf32>
    %3 = arith.mulf %0, %0 : vector<9x512xf32>
    %cst_1 = arith.constant dense<0.000000e+00> : vector<512xf32>
    %4 = vector.multi_reduction <add>, %3, %cst_1 [0] : vector<9x512xf32> to vector<512xf32>
    %5 = vector.shape_cast %4 : vector<512xf32> to vector<1x512xf32>
    %cst_2 = arith.constant dense<0.000000e+00> : vector<1xf32>
    %6 = vector.multi_reduction <add>, %2, %cst_2 [1] : vector<1x512xf32> to vector<1xf32>
    %7 = vector.shape_cast %6 : vector<1xf32> to vector<1x1xf32>
    %cst_3 = arith.constant dense<0.000000e+00> : vector<1xf32>
    %8 = vector.multi_reduction <add>, %5, %cst_3 [1] : vector<1x512xf32> to vector<1xf32>
    %9 = vector.shape_cast %8 : vector<1xf32> to vector<1x1xf32>
    %cst_4 = arith.constant 2.17013891E-4 : f32
    %10 = vector.broadcast %cst_4 : f32 to vector<1x1xf32>
    %11 = arith.mulf %7, %10 : vector<1x1xf32>
    %cst_5 = arith.constant 4.608000e+03 : f32
    %12 = vector.broadcast %cst_5 : f32 to vector<1x1xf32>
    %13 = arith.mulf %12, %11 : vector<1x1xf32>
    %14 = arith.mulf %13, %11 : vector<1x1xf32>
    %15 = arith.subf %9, %14 : vector<1x1xf32>
    %cst_6 = arith.constant 2.170610e-04 : f32
    %16 = vector.broadcast %cst_6 : f32 to vector<1x1xf32>
    %17 = arith.mulf %15, %16 : vector<1x1xf32>
    %18 = math.rsqrt %17 : vector<1x1xf32>
    %c0_7 = arith.constant 0 : index
    %c0_8 = arith.constant 0 : index
    %19 = vector.load %arg1[%c0_7, %c0_8] : memref<1x1xf32, #tpu.memory_space<vmem>>, vector<1x1xf32>
    %20 = arith.divf %18, %19 : vector<1x1xf32>
    %cst_9 = arith.constant 0.142857149 : f32
    %21 = vector.broadcast %cst_9 : f32 to vector<1x1xf32>
    %22 = arith.mulf %19, %21 : vector<1x1xf32>
    %23 = vector.broadcast %11 : vector<1x1xf32> to vector<9x512xf32>
    %24 = arith.subf %0, %23 : vector<9x512xf32>
    %25 = vector.broadcast %20 : vector<1x1xf32> to vector<9x512xf32>
    %26 = arith.mulf %24, %25 : vector<9x512xf32>
    %cst_10 = arith.constant -1.000000e+00 : f32
    %cst_11 = arith.constant 1.000000e+00 : f32
    %27 = vector.broadcast %cst_10 : f32 to vector<9x512xf32>
    %28 = arith.maximumf %27, %26 : vector<9x512xf32>
    %29 = vector.broadcast %cst_11 : f32 to vector<9x512xf32>
    %30 = arith.minimumf %29, %28 : vector<9x512xf32>
    %cst_12 = arith.constant 7.000000e+00 : f32
    %31 = vector.broadcast %cst_12 : f32 to vector<9x512xf32>
    %32 = arith.mulf %30, %31 : vector<9x512xf32>
    %33 = math.roundeven %32 : vector<9x512xf32>
    %34 = vector.broadcast %22 : vector<1x1xf32> to vector<9x512xf32>
    %35 = arith.mulf %33, %34 : vector<9x512xf32>
    %c0_13 = arith.constant 0 : index
    %c0_14 = arith.constant 0 : index
    %36 = vector.load %arg3[%c0_13, %c0_14] : memref<9x512xf32, #tpu.memory_space<vmem>>, vector<9x512xf32>
    tpu.vector_store %arg3[%c0_13, %c0_14], %35 {strides = array<i32>} : memref<9x512xf32, #tpu.memory_space<vmem>>, vector<9x512xf32>,
    return
  }
  func.func @transform_0(%arg0: i32) -> (i32, i32) {
    %c0_i32 = arith.constant 0 : i32
    %c0_i32_0 = arith.constant 0 : i32
    %c0_i32_1 = arith.constant 0 : i32
    return %c0_i32, %c0_i32_0 : i32, i32
  }
  func.func @transform_1(%arg0: i32) -> (i32, i32) {
    %c0_i32 = arith.constant 0 : i32
    %c0_i32_0 = arith.constant 0 : i32
    %c0_i32_1 = arith.constant 0 : i32
    return %c0_i32, %c0_i32_0 : i32, i32
  }
  func.func @transform_2(%arg0: i32) -> (i32, i32) {
    %c0_i32 = arith.constant 0 : i32
    %c0_i32_0 = arith.constant 0 : i32
    %c0_i32_1 = arith.constant 0 : i32
    return %c0_i32, %c0_i32_0 : i32, i32
  }
}

</mosaic_0001>

<bundles_post_ra>
// kernel: tpu_custom_call.1
= control target key start
LH: loop header
LB: loop body
LE: loop exit
PB: predicated region body
PF: predicated region fallthrough
CT: control target
= control target key end

     0   :  { %s412_s0 = inlined_call_operand.<no memory space> [shape: f32[1,1], index: 0, kind: input, shape index: {}]   ;;  %s413_s1 = inlined_call_operand.hbm [shape: f32[9,512], index: 1, kind: input, shape index: {}]   ;;  %s414_s2 = inlined_call_operand.hbm [shape: f32[9,512], index: 2, kind: output, shape index: {}]  }
   0x1   :  { %v7_v0 = vstv %s412_s0 }
   0x2   :  { %8 = vst [vmem:[#allocation2] sm:$0x1] %v7_v0 }
   0x3   :  { %9 = vsyncpa [#allocation4], 0 }
   0x4   :  { %10 = vsyncpa [#allocation5], 0  ;;  %s303_s11 = smov [#allocation3]   ;;  %s255_s15 = scalar_lea.hbm %s413_s1, 1024 }
   0x5   :  { %s18_s12 = sshll.u32 %s303_s11, 4  ;;  %p256_p0 = scmp.ne.s32.totalorder %s413_s1, %s255_s15  ;;  %s19_s12 = int_to_ptr.vmem [resolvable:$true] %s18_s12 }
   0x6   :  { %p259_p1 = scmp.lt.u32.totalorder %s255_s15, %s413_s1 }
   0x8   :  { %p261_p2 = pnand %p259_p1, %p256_p0 }
   0xa   :  { %264 = shalt.err (!%p261_p2)
}
   0xb   :  { %s265_s0 = scalar_lea.vmem %s19_s12, 1024  ;;  %p270_p4 = scmp.lt.s32.totalorder %s19_s12, %s19_s12 }
   0xc   :  { %p266_p3 = scmp.ne.s32.totalorder %s19_s12, %s265_s0  ;;  %p271_p5 = scmp.lt.s32.totalorder %s265_s0, %s265_s0 }
   0xe   :  { %p272_p6 = por %p271_p5, %p270_p4 }
  0x10   :  { %p273_p7 = pnand %p272_p6, %p266_p3 }
  0x12   :  { %276 = shalt.err (!%p273_p7)
}
  0x13   :  { %s304_s20 = smov 512   ;;  %s305_s21 = smov 32  }
  0x14   :  { %24 = dma.hbm_to_vmem [thread:$0]  %s413_s1, 1024, %s19_s12, [#allocation4], %s304_s20, %s304_s20, %s305_s21  }
  0x15   :  { %299 = dma.done.wait [#allocation4], 1024  }
  0x16   :  { %300 = vsyncadd [#allocation4], 4294966272  ;;  %vm36_vm0 = vcmask 1040384   ;;  %v341_v1 = vld [vmem:[#allocation3] sm:$0xff]  ;;  %v343_v2 = vld [vmem:[#allocation3 + $0x8] sm:$0xff]  ;;  %s307_s1 = smov [#allocation6]  }
  0x17   :  { %v345_v3 = vld [vmem:[#allocation3 + $0x10] sm:$0xff]  ;;  %v347_v4 = vld [vmem:[#allocation3 + $0x18] sm:$0xff]  ;;  %v349_v5 = vld [vmem:[#allocation3 + $0x20] sm:$0x1]  ;;  %v69_v7 = vmul.f32 %v341_v1, %v341_v1  ;;  %v70_v8 = vmul.f32 %v343_v2, %v343_v2  ;;  %s216_s24 = sshll.u32 %s307_s1, 4  ;;  %s217_s24 = int_to_ptr.vmem [resolvable:$true] %s216_s24 }
  0x18   :  { %v351_v6 = vld [vmem:[#allocation3 + $0x28] sm:$0x1]  ;;  %v71_v9 = vmul.f32 %v345_v3, %v345_v3  ;;  %v359_v10 = vld [vmem:[#allocation3 + $0x30] sm:$0x1]  ;;  %v361_v11 = vld [vmem:[#allocation3 + $0x38] sm:$0x1]  ;;  %v72_v14 = vmul.f32 %v347_v4, %v347_v4  ;;  %v73_v15 = vmul.f32 %v349_v5, %v349_v5  ;;  %p282_p9 = scmp.lt.s32.totalorder %s217_s24, %s217_s24 }
  0x19   :  { %v37_v12 = vsel %vm36_vm0, %v349_v5, 0.0  ;;  %v45_v13 = vsel %vm36_vm0, %v351_v6, 0.0  ;;  %v53_v18 = vsel %vm36_vm0, %v359_v10, 0.0  ;;  %v61_v19 = vsel %vm36_vm0, %v361_v11, 0.0  ;;  %s277_s25 = scalar_lea.vmem %s217_s24, 1024 }
  0x1a   :  { %v38_v16 = vadd.f32 %v37_v12, %v341_v1  ;;  %v46_v17 = vadd.f32 %v45_v13, %v343_v2  ;;  %v54_v20 = vadd.f32 %v53_v18, %v345_v3  ;;  %v62_v21 = vadd.f32 %v61_v19, %v347_v4  ;;  %p278_p8 = scmp.ne.s32.totalorder %s217_s24, %s277_s25  ;;  %p283_p10 = scmp.lt.s32.totalorder %s277_s25, %s277_s25 }
  0x1b   :  { %v74_v22 = vmul.f32 %v351_v6, %v351_v6  ;;  %v75_v23 = vmul.f32 %v359_v10, %v359_v10  ;;  %v76_v26 = vmul.f32 %v361_v11, %v361_v11  ;;  %v77_v27 = vsel %vm36_vm0, %v73_v15, 0.0 }
  0x1c   :  { %v39_v24 = vrot.slane %v38_v16, 4  ;;  %v47_v25 = vrot.slane %v46_v17, 4  ;;  %v55_v28 = vrot.slane %v54_v20, 4  ;;  %v63_v29 = vrot.slane %v62_v21, 4  ;;  %p284_p11 = por %p283_p10, %p282_p9 }
  0x1d   :  { %v78_v30 = vadd.f32 %v77_v27, %v69_v7  ;;  %v85_v31 = vsel %vm36_vm0, %v74_v22, 0.0  ;;  %v93_v35 = vsel %vm36_vm0, %v75_v23, 0.0  ;;  %v101_v43 = vsel %vm36_vm0, %v76_v26, 0.0 }
  0x1e   :  { %v40_v32 = vadd.f32 %v39_v24, %v38_v16  ;;  %v48_v33 = vadd.f32 %v47_v25, %v46_v17  ;;  %v86_v34 = vadd.f32 %v85_v31, %v70_v8  ;;  %v56_v36 = vadd.f32 %v55_v28, %v54_v20  ;;  %p285_p12 = pnand %p284_p11, %p278_p8 }
  0x1f   :  { %v64_v37 = vadd.f32 %v63_v29, %v62_v21  ;;  %v79_v38 = vrot.slane %v78_v30, 4  ;;  %v94_v39 = vadd.f32 %v93_v35, %v71_v9  ;;  %v102_v51 = vadd.f32 %v101_v43, %v72_v14 }
  0x20   :  { %v41_v40 = vrot.slane %v40_v32, 2  ;;  %v49_v41 = vrot.slane %v48_v33, 2  ;;  %v87_v42 = vrot.slane %v86_v34, 4  ;;  %v57_v44 = vrot.slane %v56_v36, 2 }
  0x21   :  { %v65_v45 = vrot.slane %v64_v37, 2  ;;  %v80_v46 = vadd.f32 %v79_v38, %v78_v30  ;;  %v95_v47 = vrot.slane %v94_v39, 4  ;;  %v103_v59 = vrot.slane %v102_v51, 4 }
  0x22   :  { %v42_v48 = vadd.f32 %v41_v40, %v40_v32  ;;  %v50_v49 = vadd.f32 %v49_v41, %v48_v33  ;;  %v88_v50 = vadd.f32 %v87_v42, %v86_v34  ;;  %v58_v52 = vadd.f32 %v57_v44, %v56_v36 }
  0x23   :  { %v66_v53 = vadd.f32 %v65_v45, %v64_v37  ;;  %v81_v54 = vrot.slane %v80_v46, 2  ;;  %v96_v55 = vadd.f32 %v95_v47, %v94_v39  ;;  %v104_v9 = vadd.f32 %v103_v59, %v102_v51  ;;  %v125_v37 = vld [vmem:[#allocation2] sm:$0x1] }
  0x24   :  { %v43_v56 = vrot.slane %v42_v48, 1  ;;  %v51_v57 = vrot.slane %v50_v49, 1  ;;  %v89_v58 = vrot.slane %v88_v50, 2  ;;  %v59_v60 = vrot.slane %v58_v52, 1 }
  0x25   :  { %v67_v61 = vrot.slane %v66_v53, 1  ;;  %v82_v62 = vadd.f32 %v81_v54, %v80_v46  ;;  %v97_v63 = vrot.slane %v96_v55, 2  ;;  %v105_v18 = vrot.slane %v104_v9, 2 }
  0x26   :  { %v44_v0 = vadd.f32 %v43_v56, %v42_v48  ;;  %v52_v7 = vadd.f32 %v51_v57, %v50_v49  ;;  %v90_v8 = vadd.f32 %v89_v58, %v88_v50  ;;  %v60_v12 = vadd.f32 %v59_v60, %v58_v52 }
  0x27   :  { %v83_v13 = vrot.slane %v82_v62, 1  ;;  %v98_v15 = vadd.f32 %v97_v63, %v96_v55  ;;  %v68_v14 = vadd.f32 %v67_v61, %v66_v53  ;;  %v106_v23 = vadd.f32 %v105_v18, %v104_v9 }
  0x28   :  { %v109_v16 = vadd.f32 %v52_v7, %v44_v0  ;;  %v91_v17 = vrot.slane %v90_v8, 1  ;;  %v306_v31 = vmov 0   ;;  %251 = vrcp.f32 %v125_v37 }
  0x29   :  { %v84_v19 = vadd.f32 %v83_v13, %v82_v62  ;;  %v99_v20 = vrot.slane %v98_v15, 1  ;;  %v107_v26 = vrot.slane %v106_v23, 1  ;;  %249 = vset.pattern.permute.xlu1 %v306_v31  ;;  %250 = vset.pattern.permute.xlu0 %v306_v31  ;;  %v138_v40 = vlaneseq }
  0x2a   :  { %v110_v21 = vadd.f32 %v109_v16, %v60_v12  ;;  %v92_v22 = vadd.f32 %v91_v17, %v90_v8  ;;  %v128_v46 = vmul.f32 0.14285715, %v125_v37 }
  0x2b   :  { %v100_v24 = vadd.f32 %v99_v20, %v98_v15  ;;  %v108_v28 = vadd.f32 %v107_v26, %v106_v23  ;;  %v139_v41 = vshrl.u32 %v138_v40, 7 }
  0x2c   :  { %v111_v25 = vadd.f32 %v110_v21, %v68_v14  ;;  %v114_v27 = vadd.f32 %v92_v22, %v84_v19 }
  0x2d   :  { %v140_v43 = vsub.s32 0, %v139_v41 }
  0x2e   :  { %112 = vadd.xlane.f32.xlu0 %v111_v25  ;;  %v115_v29 = vadd.f32 %v114_v27, %v100_v24 }
  0x2f   :  { %v190_v48 = vrot.slane %v128_v46, %v140_v43 }
  0x30   :  { %v116_v30 = vadd.f32 %v115_v29, %v108_v28 }
  0x32   :  { %117 = vadd.xlane.f32.xlu0 %v116_v30  ;;  %v252_v42 = vpop.eup %251 }
  0xbb   :  { %v113_v32 = vpop.xlane.xlu0 %112 }
  0xbc   :  { %v119_v33 = vmul.f32 0.00021701389, %v113_v32 }
  0xbe   :  { %v120_v34 = vmul.f32 4608.0, %v119_v33  ;;  %v129_v49 = vsub.f32 %v341_v1, %v119_v33  ;;  %v130_v50 = vsub.f32 %v343_v2, %v119_v33  ;;  %v131_v51 = vsub.f32 %v345_v3, %v119_v33 }
  0xbf   :  { %v118_v35 = vpop.xlane.xlu0 %117  ;;  %v132_v52 = vsub.f32 %v347_v4, %v119_v33  ;;  %v133_v54 = vsub.f32 %v349_v5, %v119_v33  ;;  %v134_v55 = vsub.f32 %v351_v6, %v119_v33  ;;  %v135_v56 = vsub.f32 %v359_v10, %v119_v33 }
  0xc0   :  { %v121_v36 = vmul.f32 %v120_v34, %v119_v33  ;;  %v136_v57 = vsub.f32 %v361_v11, %v119_v33 }
  0xc2   :  { %v122_v38 = vsub.f32 %v118_v35, %v121_v36 }
  0xc4   :  { %v123_v39 = vmul.f32 0.000217061, %v122_v38 }
  0xc6   :  { %253 = vrsqrt.f32 %v123_v39 }
  0xd0   :  { %v254_v44 = vpop.eup %253 }
  0xd1   :  { %v127_v45 = vmul.f32 %v254_v44, %v252_v42 }
  0xd3   :  { %v141_v47 = vrot.slane %v127_v45, %v140_v43 }
  0xd5   :  { %143 = vperm.xlu1 %249, %v141_v47  }
  0xd9   :  { %192 = vperm.xlu1 %249, %v190_v48  }
 0x154   :  { %v144_v53 = vpop.permute.xlu1 %143 }
 0x155   :  { %v146_v58 = vmul.f32 %v144_v53, %v129_v49  ;;  %v147_v59 = vmul.f32 %v144_v53, %v130_v50  ;;  %v148_v60 = vmul.f32 %v144_v53, %v131_v51  ;;  %v149_v61 = vmul.f32 %v144_v53, %v132_v52 }
 0x156   :  { %v150_v1 = vmul.f32 %v144_v53, %v133_v54  ;;  %v151_v62 = vmul.f32 %v144_v53, %v134_v55  ;;  %v152_v2 = vmul.f32 %v144_v53, %v135_v56  ;;  %v153_v63 = vmul.f32 %v144_v53, %v136_v57 }
 0x157   :  { %v228_v3 = vclamps-f32 %v146_v58, 1.0  ;;  %v229_v0 = vclamps-f32 %v147_v59, 1.0  ;;  %v230_v4 = vclamps-f32 %v148_v60, 1.0  ;;  %v231_v7 = vclamps-f32 %v149_v61, 1.0 }
 0x158   :  { %v232_v8 = vclamps-f32 %v150_v1, 1.0  ;;  %v233_v5 = vclamps-f32 %v151_v62, 1.0  ;;  %v234_v9 = vclamps-f32 %v152_v2, 1.0  ;;  %v235_v6 = vclamps-f32 %v153_v63, 1.0  ;;  %v193_v26 = vpop.permute.xlu1 %192 }
 0x159   :  { %v170_v12 = vmul.f32 7.0, %v228_v3  ;;  %v171_v10 = vmul.f32 7.0, %v229_v0  ;;  %v172_v13 = vmul.f32 7.0, %v230_v4  ;;  %v173_v11 = vmul.f32 7.0, %v231_v7 }
 0x15a   :  { %v174_v15 = vmul.f32 7.0, %v232_v8  ;;  %v175_v14 = vmul.f32 7.0, %v233_v5  ;;  %v176_v16 = vmul.f32 7.0, %v234_v9  ;;  %v177_v17 = vmul.f32 7.0, %v235_v6 }
 0x15b   :  { %v236_v18 = vround.rtne.f32 %v170_v12  ;;  %v237_v19 = vround.rtne.f32 %v171_v10  ;;  %v238_v20 = vround.rtne.f32 %v172_v13  ;;  %v239_v21 = vround.rtne.f32 %v173_v11 }
 0x15c   :  { %v240_v22 = vround.rtne.f32 %v174_v15  ;;  %v241_v23 = vround.rtne.f32 %v175_v14  ;;  %v242_v24 = vround.rtne.f32 %v176_v16  ;;  %v243_v25 = vround.rtne.f32 %v177_v17 }
 0x15d   :  { %v195_v27 = vmul.f32 %v236_v18, %v193_v26  ;;  %v196_v28 = vmul.f32 %v237_v19, %v193_v26  ;;  %v197_v29 = vmul.f32 %v238_v20, %v193_v26  ;;  %v198_v30 = vmul.f32 %v239_v21, %v193_v26 }
 0x15e   :  { %v199_v31 = vmul.f32 %v240_v22, %v193_v26  ;;  %v200_v32 = vmul.f32 %v241_v23, %v193_v26  ;;  %v201_v33 = vmul.f32 %v242_v24, %v193_v26  ;;  %v202_v34 = vmul.f32 %v243_v25, %v193_v26 }
 0x15f   :  { %203 = vst [vmem:[#allocation6] sm:$0xff] %v195_v27  ;;  %204 = vst [vmem:[#allocation6 + $0x8] sm:$0xff] %v196_v28 }
 0x160   :  { %205 = vst [vmem:[#allocation6 + $0x10] sm:$0xff] %v197_v29  ;;  %206 = vst [vmem:[#allocation6 + $0x18] sm:$0xff] %v198_v30 }
 0x161   :  { %207 = vst [vmem:[#allocation6 + $0x20] sm:$0x1] %v199_v31  ;;  %208 = vst [vmem:[#allocation6 + $0x28] sm:$0x1] %v200_v32 }
 0x162   :  { %209 = vst [vmem:[#allocation6 + $0x30] sm:$0x1] %v201_v33  ;;  %210 = vst [vmem:[#allocation6 + $0x38] sm:$0x1] %v202_v34 }
 0x163   :  { %288 = shalt.err (!%p285_p12)
}
 0x164   :  { %s289_s28 = scalar_lea.hbm %s414_s2, 1024 }
 0x165   :  { %p290_p13 = scmp.ne.s32.totalorder %s414_s2, %s289_s28  ;;  %p293_p0 = scmp.lt.u32.totalorder %s289_s28, %s414_s2 }
 0x167   :  { %p295_p1 = pnand %p293_p0, %p290_p13 }
 0x169   :  { %298 = shalt.err (!%p295_p1)
}
 0x16a   :  { %222 = dma.vmem_to_hbm [thread:$0]  %s217_s24, 1024, %s414_s2, [#allocation5], %s304_s20, %s304_s20, %s305_s21  }
 0x16b   :  { %301 = dma.done.wait [#allocation5], 1024  }
 0x16c   :  { %302 = vsyncadd [#allocation5], 4294966272 }
 0x16d   :  { %226 = vsyncpa [#allocation4], 1 }
 0x16e   :  { %227 = vsyncpa [#allocation5], 1 }

</bundles_post_ra>
